<compile_context>
chip_gen: v7x
topology: tpu7x:2x2x1
jax: 0.10.0
libtpu: 0.0.40
codegen_flags: <defaults>
</compile_context>

<pallas_src>
import functools

import jax
import jax.numpy as jnp
from jax.experimental import pallas as pl
from jax.experimental.pallas import tpu as pltpu


# ----------------------------------------------------------------------------
# Pallas kernels
# ----------------------------------------------------------------------------
def _bn_stats_kernel(xh_ref, xl_ref, gh_ref, bh_ref, gl_ref, bl_ref,
                     sth_ref, stl_ref, *, eps):
    """Training-mode BatchNorm2d batch statistics -> per-channel scale/shift.

    One pass: var = E[x^2] - E[x]^2.  Outputs are (2, C): row0=scale, row1=shift
    with  bn(x) = x * scale + shift.
    """
    def stats(x, g, b):
        cnt = float(x.shape[0] * x.shape[1] * x.shape[2])
        s = jnp.sum(x, axis=(0, 1, 2), keepdims=True)           # (1,1,1,C)
        ss = jnp.sum(x * x, axis=(0, 1, 2), keepdims=True)      # (1,1,1,C)
        mean = s * (1.0 / cnt)
        var = ss * (1.0 / cnt) - mean * mean                    # biased var
        scale = g * jax.lax.rsqrt(var + eps)
        shift = b - mean * scale
        c = x.shape[3]
        return scale.reshape(1, c), shift.reshape(1, c)

    sc_h, sh_h = stats(xh_ref[...], gh_ref[...], bh_ref[...])
    sth_ref[0:1, :] = sc_h
    sth_ref[1:2, :] = sh_h
    sc_l, sh_l = stats(xl_ref[...], gl_ref[...], bl_ref[...])
    stl_ref[0:1, :] = sc_l
    stl_ref[1:2, :] = sh_l


def _octconv_fused_kernel(xh_ref, xl_ref, sth_ref, stl_ref,
                          bhh_ref, blh_ref, bhl_ref, bll_ref,
                          bias_h_ref, bias_l_ref,
                          hpool_ref, wpool_ref, dup_ref,
                          oh_ref, ol_ref,
                          xh_pad, xl_pad, xp_pad,
                          *, H, pad, KH):
    """Fused BN-apply + full OctConv for one batch element.

    Packed layouts: every activation is (row, W*C); banded weights already
    contain the KW taps and column zero-padding, so each conv is KH matmuls
    over row-padded data.
    """
    f32 = jnp.float32
    Hl = H // 2

    # ---- BatchNorm apply (scale/shift pre-tiled over the W*C lane axis) ----
    xh = xh_ref[0] * sth_ref[0:1, :] + sth_ref[1:2, :]      # (H,  W *cin_h)
    xl = xl_ref[0] * stl_ref[0:1, :] + stl_ref[1:2, :]      # (Hl, Wl*cin_l)

    # ---- row-padded copies in VMEM (column padding lives in the weights) ---
    xh_pad[...] = jnp.zeros_like(xh_pad)
    xl_pad[...] = jnp.zeros_like(xl_pad)
    xp_pad[...] = jnp.zeros_like(xp_pad)
    xh_pad[pad:pad + H, :] = xh
    xl_pad[pad:pad + Hl, :] = xl

    # ---- fused 2x2 average pool of the BN'd high branch (two matmuls) ------
    pooled = jnp.dot(jnp.dot(hpool_ref[...], xh, preferred_element_type=f32),
                     wpool_ref[...], preferred_element_type=f32)  # (Hl, Wl*cin_h)
    xp_pad[pad:pad + Hl, :] = pooled

    # ---- out_h = conv_hh(x_h) + upsample2x(conv_lh(x_l)) + (b_hh + b_lh) ---
    acc_h = jnp.zeros(oh_ref.shape[1:], f32)                 # (H,  W*cout_h)
    z_lh = jnp.zeros((Hl, oh_ref.shape[2]), f32)             # column-upsampled
    for kh in range(KH):                                     # static unroll
        acc_h = acc_h + jnp.dot(xh_pad[kh:kh + H, :], bhh_ref[kh],
                                preferred_element_type=f32)
        z_lh = z_lh + jnp.dot(xl_pad[kh:kh + Hl, :], blh_ref[kh],
                              preferred_element_type=f32)
    # nearest-neighbour row upsample via a 0/1 duplication matrix
    acc_h = acc_h + jnp.dot(dup_ref[...], z_lh, preferred_element_type=f32)
    oh_ref[0] = (acc_h + bias_h_ref[...]).astype(oh_ref.dtype)

    # ---- out_l = conv_hl(avgpool(x_h)) + conv_ll(x_l) + (b_hl + b_ll) ------
    acc_l = jnp.zeros(ol_ref.shape[1:], f32)                 # (Hl, Wl*cout_l)
    for kh in range(KH):
        acc_l = acc_l + jnp.dot(xp_pad[kh:kh + Hl, :], bhl_ref[kh],
                                preferred_element_type=f32)
        acc_l = acc_l + jnp.dot(xl_pad[kh:kh + Hl, :], bll_ref[kh],
                                preferred_element_type=f32)
    ol_ref[0] = (acc_l + bias_l_ref[...]).astype(ol_ref.dtype)


# ----------------------------------------------------------------------------
# Host-side helpers (weight restructuring, tiny constant matrices)
# ----------------------------------------------------------------------------
def _banded_conv_weight(w_hwio, in_w, out_cols, pad):
    """Fold KW taps + column zero padding of a stride-1 conv into a matrix.

    With a row-padded packed input x_rp of shape (rows, in_w*Cin):
        out[i, w*Cout + co] = sum_kh sum_{wp,ci}
            x_rp[i + kh, wp*Cin + ci] * B[kh, wp*Cin + ci, w*Cout + co]
    out_cols[w] is the input-column base for output column w (arange(Wo) for a
    plain conv, arange(Wo)//2 to fuse a 2x nearest column-upsample).
    """
    KH, KW, cin, cout = w_hwio.shape
    wp = jnp.arange(in_w)[:, None]                 # (in_w, 1)
    wo = jnp.asarray(out_cols)[None, :]            # (1, n_out)
    kw = wp - wo + pad
    valid = (kw >= 0) & (kw < KW)
    g = w_hwio[:, jnp.clip(kw, 0, KW - 1), :, :]   # (KH, in_w, n_out, cin, cout)
    g = jnp.where(valid[None, :, :, None, None], g, 0.0)
    g = jnp.transpose(g, (0, 1, 3, 2, 4))          # (KH, in_w, cin, n_out, cout)
    return g.reshape(KH, in_w * cin, wo.shape[1] * cout)


def _pool_and_dup_matrices(H, W, cin_h):
    """Constant matrices: 2x2 avg-pool (rows / packed cols) and 2x row-dup."""
    Hl, Wl = H // 2, W // 2
    hpool = (jnp.arange(H)[None, :] // 2 ==
             jnp.arange(Hl)[:, None]).astype(jnp.float32) * 0.5       # (Hl, H)
    lane = jnp.arange(W * cin_h)[:, None]
    q = jnp.arange(Wl * cin_h)[None, :]
    wpool = ((((lane // cin_h) // 2) == (q // cin_h)) &
             ((lane % cin_h) == (q % cin_h))).astype(jnp.float32) * 0.5  # (W*c, Wl*c)
    dup = (jnp.arange(Hl)[None, :] ==
           jnp.arange(H)[:, None] // 2).astype(jnp.float32)           # (H, Hl)
    return hpool, wpool, dup


# ----------------------------------------------------------------------------
# OctConv2dBN forward (Pallas path)
# ----------------------------------------------------------------------------
def octconv2d_bn_pallas(x_nchw, params, cfg, eps=1e-5):
    in_h, in_l = cfg["in_h"], cfg["in_l"]
    out_h_c, out_l_c = cfg["out_h"], cfg["out_l"]
    pad = cfg["padding"]
    KH = params["w_hh"].shape[0]
    assert in_h > 0 and in_l > 0 and out_h_c > 0 and out_l_c > 0, \
        "fused Pallas path implements the full OctConv configuration"
    assert 2 * pad == KH - 1, "fused Pallas path assumes stride-1 'same' conv"

    N, _, H, W = x_nchw.shape
    assert H % 2 == 0 and W % 2 == 0
    Hl, Wl = H // 2, W // 2

    # --- decompose_input (host-side glue on tiny tensors) --------------------
    x = jnp.transpose(x_nchw, (0, 2, 3, 1))                  # NCHW -> NHWC
    x_h = x[..., :in_h]                                      # (N,H,W,in_h)
    agg = x[..., in_h:]
    x_l = jnp.concatenate(
        [agg[:, :Hl, :Wl, :], agg[:, :Hl, Wl:, :],
         agg[:, Hl:, :Wl, :], agg[:, Hl:, Wl:, :]], axis=-1)  # (N,Hl,Wl,in_l)

    # --- BN batch statistics -> per-channel scale/shift (one tiny kernel) ----
    st_h, st_l = pl.pallas_call(
        functools.partial(_bn_stats_kernel, eps=eps),
        out_shape=(jax.ShapeDtypeStruct((2, in_h), jnp.float32),
                   jax.ShapeDtypeStruct((2, in_l), jnp.float32)),
    )(x_h, x_l, params["bn_h_gamma"], params["bn_h_beta"],
      params["bn_l_gamma"], params["bn_l_beta"])

    # --- lane-dense (row, W*C) packing + folded weights ----------------------
    xh_flat = x_h.reshape(N, H, W * in_h)                    # (N,16,128)
    xl_flat = x_l.reshape(N, Hl, Wl * in_l)                  # (N, 8, 64)
    sth = jnp.tile(st_h, (1, W))                             # (2, 128)
    stl = jnp.tile(st_l, (1, Wl))                            # (2, 64)
    bias_h = jnp.tile((params["b_hh"] + params["b_lh"]).reshape(1, -1), (1, W))
    bias_l = jnp.tile((params["b_hl"] + params["b_ll"]).reshape(1, -1), (1, Wl))

    b_hh = _banded_conv_weight(params["w_hh"], W, jnp.arange(W), pad)
    b_lh = _banded_conv_weight(params["w_lh"], Wl, jnp.arange(W) // 2, pad)
    b_hl = _banded_conv_weight(params["w_hl"], Wl, jnp.arange(Wl), pad)
    b_ll = _banded_conv_weight(params["w_ll"], Wl, jnp.arange(Wl), pad)
    hpool, wpool, dup = _pool_and_dup_matrices(H, W, in_h)

    kern = functools.partial(_octconv_fused_kernel, H=H, pad=pad, KH=KH)

    oh_flat, ol_flat = pl.pallas_call(
        kern,
        out_shape=(jax.ShapeDtypeStruct((N, H, W * out_h_c), jnp.float32),
                   jax.ShapeDtypeStruct((N, Hl, Wl * out_l_c), jnp.float32)),
        grid=(N,),
        in_specs=[
            pl.BlockSpec((1, H, W * in_h), lambda n: (n, 0, 0)),
            pl.BlockSpec((1, Hl, Wl * in_l), lambda n: (n, 0, 0)),
            pl.BlockSpec((2, W * in_h), lambda n: (0, 0)),
            pl.BlockSpec((2, Wl * in_l), lambda n: (0, 0)),
            pl.BlockSpec((KH, W * in_h, W * out_h_c), lambda n: (0, 0, 0)),
            pl.BlockSpec((KH, Wl * in_l, W * out_h_c), lambda n: (0, 0, 0)),
            pl.BlockSpec((KH, Wl * in_h, Wl * out_l_c), lambda n: (0, 0, 0)),
            pl.BlockSpec((KH, Wl * in_l, Wl * out_l_c), lambda n: (0, 0, 0)),
            pl.BlockSpec((1, W * out_h_c), lambda n: (0, 0)),
            pl.BlockSpec((1, Wl * out_l_c), lambda n: (0, 0)),
            pl.BlockSpec((Hl, H), lambda n: (0, 0)),
            pl.BlockSpec((W * in_h, Wl * in_h), lambda n: (0, 0)),
            pl.BlockSpec((H, Hl), lambda n: (0, 0)),
        ],
        out_specs=(
            pl.BlockSpec((1, H, W * out_h_c), lambda n: (n, 0, 0)),
            pl.BlockSpec((1, Hl, Wl * out_l_c), lambda n: (n, 0, 0)),
        ),
        scratch_shapes=[
            pltpu.VMEM((H + 2 * pad, W * in_h), jnp.float32),    # row-padded x_h
            pltpu.VMEM((Hl + 2 * pad, Wl * in_l), jnp.float32),  # row-padded x_l
            pltpu.VMEM((Hl + 2 * pad, Wl * in_h), jnp.float32),  # row-padded pooled
        ],
        compiler_params=pltpu.CompilerParams(
            dimension_semantics=("parallel",)),
    )(xh_flat, xl_flat, sth, stl, b_hh, b_lh, b_hl, b_ll,
      bias_h, bias_l, hpool, wpool, dup)

    # --- compose_output (host-side glue on tiny tensors) ---------------------
    oh = oh_flat.reshape(N, H, W, out_h_c)
    ol = ol_flat.reshape(N, Hl, Wl, out_l_c)
    c4 = out_l_c // 4
    l0, l1, l2, l3 = (ol[..., i * c4:(i + 1) * c4] for i in range(4))
    agg_o = jnp.concatenate([jnp.concatenate([l0, l1], axis=2),
                             jnp.concatenate([l2, l3], axis=2)], axis=1)
    out = jnp.concatenate([oh, agg_o], axis=-1)
    return jnp.transpose(out, (0, 3, 1, 2))                  # NHWC -> NCHW


# ----------------------------------------------------------------------------
# Pure-JAX reference (correctness check only)
# ----------------------------------------------------------------------------
def _bn_ref(x, gamma, beta, eps=1e-5):
    m = jnp.mean(x, axis=(0, 1, 2), keepdims=True)
    v = jnp.mean((x - m) ** 2, axis=(0, 1, 2), keepdims=True)
    return (x - m) * jax.lax.rsqrt(v + eps) * gamma + beta


def _conv_ref(x, w, b, padding):
    y = jax.lax.conv_general_dilated(
        x, w, window_strides=(1, 1),
        padding=[(padding, padding), (padding, padding)],
        dimension_numbers=("NHWC", "HWIO", "NHWC"))
    return y + b.reshape(1, 1, 1, -1)


def octconv2d_bn_ref(x_nchw, params, cfg):
    in_h = cfg["in_h"]
    pad = cfg["padding"]
    N, _, H, W = x_nchw.shape
    Hl, Wl = H // 2, W // 2
    x = jnp.transpose(x_nchw, (0, 2, 3, 1))
    x_h = x[..., :in_h]
    agg = x[..., in_h:]
    x_l = jnp.concatenate(
        [agg[:, :Hl, :Wl, :], agg[:, :Hl, Wl:, :],
         agg[:, Hl:, :Wl, :], agg[:, Hl:, Wl:, :]], axis=-1)
    x_h = _bn_ref(x_h, params["bn_h_gamma"], params["bn_h_beta"])
    x_l = _bn_ref(x_l, params["bn_l_gamma"], params["bn_l_beta"])

    z_lh = _conv_ref(x_l, params["w_lh"], params["b_lh"], pad)
    up = jnp.repeat(jnp.repeat(z_lh, 2, axis=1), 2, axis=2)
    out_h = _conv_ref(x_h, params["w_hh"], params["b_hh"], pad) + up
    n, hh, ww, c = x_h.shape
    pool = x_h.reshape(n, hh // 2, 2, ww // 2, 2, c).mean(axis=(2, 4))
    out_l = (_conv_ref(pool, params["w_hl"], params["b_hl"], pad) +
             _conv_ref(x_l, params["w_ll"], params["b_ll"], pad))

    c4 = out_l.shape[-1] // 4
    l0, l1, l2, l3 = (out_l[..., i * c4:(i + 1) * c4] for i in range(4))
    agg_o = jnp.concatenate([jnp.concatenate([l0, l1], axis=2),
                             jnp.concatenate([l2, l3], axis=2)], axis=1)
    out = jnp.concatenate([out_h, agg_o], axis=-1)
    return jnp.transpose(out, (0, 3, 1, 2))


# ----------------------------------------------------------------------------
# Deterministic parameter init (shapes per OctConv2dBN.__init__)
# ----------------------------------------------------------------------------
def init_params(key, in_channels, out_channels, k, alpha_in, alpha_out, padding):
    in_l = int(alpha_in * in_channels)
    out_l = int(alpha_out * out_channels)
    assert in_l % 4 == 0 and out_l % 4 == 0
    in_h = in_channels - in_l
    out_h = out_channels - out_l

    def conv_init(kk, cin, cout):
        k1, k2 = jax.random.split(kk)
        bound = 1.0 / (cin * k * k) ** 0.5
        w = jax.random.uniform(k1, (k, k, cin, cout), jnp.float32, -bound, bound)
        b = jax.random.uniform(k2, (1, cout), jnp.float32, -bound, bound)
        return w, b

    keys = jax.random.split(key, 4)
    p = {}
    p["w_hh"], p["b_hh"] = conv_init(keys[0], in_h, out_h)   # conv_hh
    p["w_ll"], p["b_ll"] = conv_init(keys[1], in_l, out_l)   # conv_ll
    p["w_lh"], p["b_lh"] = conv_init(keys[2], in_l, out_h)   # conv_lh
    p["w_hl"], p["b_hl"] = conv_init(keys[3], in_h, out_l)   # conv_hl
    p["bn_h_gamma"] = jnp.ones((1, 1, 1, in_h), jnp.float32)
    p["bn_h_beta"] = jnp.zeros((1, 1, 1, in_h), jnp.float32)
    p["bn_l_gamma"] = jnp.ones((1, 1, 1, in_l), jnp.float32)
    p["bn_l_beta"] = jnp.zeros((1, 1, 1, in_l), jnp.float32)
    cfg = dict(in_h=in_h, in_l=in_l, out_h=out_h, out_l=out_l, padding=padding)
    return p, cfg


# ----------------------------------------------------------------------------
if __name__ == "__main__":
    key = jax.random.PRNGKey(0)

    # OctConv2dBN(in_channels=16, out_channels=16, kernel_size=3,
    #             alpha_in=0.5, alpha_out=0.5, stride=1, padding=1)
    in_channels, out_channels = 16, 16
    alpha_in = alpha_out = 0.5
    k, padding = 3, 1

    pkey, xkey = jax.random.split(key)
    params, cfg = init_params(pkey, in_channels, out_channels, k,
                              alpha_in, alpha_out, padding)

    # composed input: (N, in_channels_h + in_channels_l // 4, H, W)
    N, H, W = 2, 16, 16
    c_in_composed = cfg["in_h"] + cfg["in_l"] // 4            # 8 + 2 = 10
    x = jax.random.normal(xkey, (N, c_in_composed, H, W), jnp.float32)

    out = octconv2d_bn_pallas(x, params, cfg)
    out = jax.block_until_ready(out)

    ref = octconv2d_bn_ref(x, params, cfg)
    ref = jax.block_until_ready(ref)

    c_out_composed = cfg["out_h"] + cfg["out_l"] // 4         # 8 + 2 = 10
    assert out.shape == (N, c_out_composed, H, W), out.shape
    assert bool(jnp.all(jnp.isfinite(out)))
    assert bool(jnp.allclose(out, ref, atol=2e-3, rtol=2e-3)), \
        float(jnp.max(jnp.abs(out - ref)))

    print("KERNEL_OK")
</pallas_src>

<mosaic_0001>
module attributes {stable_mosaic.version = 11 : i64} {
  func.func @_bn_stats_kernel(%arg0: memref<2x16x16x8xf32, #tpu.memory_space<vmem>>, %arg1: memref<2x8x8x8xf32, #tpu.memory_space<vmem>>, %arg2: memref<1x1x1x8xf32, #tpu.memory_space<vmem>>, %arg3: memref<1x1x1x8xf32, #tpu.memory_space<vmem>>, %arg4: memref<1x1x1x8xf32, #tpu.memory_space<vmem>>, %arg5: memref<1x1x1x8xf32, #tpu.memory_space<vmem>>, %arg6: memref<2x8xf32, #tpu.memory_space<vmem>>, %arg7: memref<2x8xf32, #tpu.memory_space<vmem>>) attributes {dimension_semantics = [], scalar_prefetch = 0 : i64, scratch_operands = 0 : i64, tpu.core_type = #tpu.core_type<tc>} {
    %c0 = arith.constant 0 : index
    %c0_0 = arith.constant 0 : index
    %c0_1 = arith.constant 0 : index
    %c0_2 = arith.constant 0 : index
    %0 = vector.load %arg0[%c0, %c0_0, %c0_1, %c0_2] : memref<2x16x16x8xf32, #tpu.memory_space<vmem>>, vector<2x16x16x8xf32>
    %c0_3 = arith.constant 0 : index
    %c0_4 = arith.constant 0 : index
    %c0_5 = arith.constant 0 : index
    %c0_6 = arith.constant 0 : index
    %1 = vector.load %arg2[%c0_3, %c0_4, %c0_5, %c0_6] : memref<1x1x1x8xf32, #tpu.memory_space<vmem>>, vector<1x1x1x8xf32>
    %c0_7 = arith.constant 0 : index
    %c0_8 = arith.constant 0 : index
    %c0_9 = arith.constant 0 : index
    %c0_10 = arith.constant 0 : index
    %2 = vector.load %arg3[%c0_7, %c0_8, %c0_9, %c0_10] : memref<1x1x1x8xf32, #tpu.memory_space<vmem>>, vector<1x1x1x8xf32>
    %cst = arith.constant dense<0.000000e+00> : vector<8xf32>
    %3 = vector.multi_reduction <add>, %0, %cst [0, 1, 2] : vector<2x16x16x8xf32> to vector<8xf32>
    %4 = vector.shape_cast %3 : vector<8xf32> to vector<1x1x1x8xf32>
    %5 = arith.mulf %0, %0 : vector<2x16x16x8xf32>
    %cst_11 = arith.constant dense<0.000000e+00> : vector<8xf32>
    %6 = vector.multi_reduction <add>, %5, %cst_11 [0, 1, 2] : vector<2x16x16x8xf32> to vector<8xf32>
    %7 = vector.shape_cast %6 : vector<8xf32> to vector<1x1x1x8xf32>
    %cst_12 = arith.constant 0.001953125 : f32
    %8 = vector.broadcast %cst_12 : f32 to vector<1x1x1x8xf32>
    %9 = arith.mulf %4, %8 : vector<1x1x1x8xf32>
    %cst_13 = arith.constant 0.001953125 : f32
    %10 = vector.broadcast %cst_13 : f32 to vector<1x1x1x8xf32>
    %11 = arith.mulf %7, %10 : vector<1x1x1x8xf32>
    %12 = arith.mulf %9, %9 : vector<1x1x1x8xf32>
    %13 = arith.subf %11, %12 : vector<1x1x1x8xf32>
    %cst_14 = arith.constant 9.99999974E-6 : f32
    %14 = vector.broadcast %cst_14 : f32 to vector<1x1x1x8xf32>
    %15 = arith.addf %13, %14 : vector<1x1x1x8xf32>
    %16 = math.rsqrt %15 : vector<1x1x1x8xf32>
    %17 = arith.mulf %1, %16 : vector<1x1x1x8xf32>
    %18 = arith.mulf %9, %17 : vector<1x1x1x8xf32>
    %19 = arith.subf %2, %18 : vector<1x1x1x8xf32>
    %20 = vector.shape_cast %17 : vector<1x1x1x8xf32> to vector<1x8xf32>
    %21 = vector.shape_cast %19 : vector<1x1x1x8xf32> to vector<1x8xf32>
    %c0_15 = arith.constant 0 : index
    %c0_16 = arith.constant 0 : index
    %22 = vector.load %arg6[%c0_15, %c0_16] : memref<2x8xf32, #tpu.memory_space<vmem>>, vector<1x8xf32>
    tpu.vector_store %arg6[%c0_15, %c0_16], %20 {strides = array<i32>} : memref<2x8xf32, #tpu.memory_space<vmem>>, vector<1x8xf32>,
    %c1 = arith.constant 1 : index
    %c0_17 = arith.constant 0 : index
    %23 = vector.load %arg6[%c1, %c0_17] : memref<2x8xf32, #tpu.memory_space<vmem>>, vector<1x8xf32>
    tpu.vector_store %arg6[%c1, %c0_17], %21 {strides = array<i32>} : memref<2x8xf32, #tpu.memory_space<vmem>>, vector<1x8xf32>,
    %c0_18 = arith.constant 0 : index
    %c0_19 = arith.constant 0 : index
    %c0_20 = arith.constant 0 : index
    %c0_21 = arith.constant 0 : index
    %24 = vector.load %arg1[%c0_18, %c0_19, %c0_20, %c0_21] : memref<2x8x8x8xf32, #tpu.memory_space<vmem>>, vector<2x8x8x8xf32>
    %c0_22 = arith.constant 0 : index
    %c0_23 = arith.constant 0 : index
    %c0_24 = arith.constant 0 : index
    %c0_25 = arith.constant 0 : index
    %25 = vector.load %arg4[%c0_22, %c0_23, %c0_24, %c0_25] : memref<1x1x1x8xf32, #tpu.memory_space<vmem>>, vector<1x1x1x8xf32>
    %c0_26 = arith.constant 0 : index
    %c0_27 = arith.constant 0 : index
    %c0_28 = arith.constant 0 : index
    %c0_29 = arith.constant 0 : index
    %26 = vector.load %arg5[%c0_26, %c0_27, %c0_28, %c0_29] : memref<1x1x1x8xf32, #tpu.memory_space<vmem>>, vector<1x1x1x8xf32>
    %cst_30 = arith.constant dense<0.000000e+00> : vector<8xf32>
    %27 = vector.multi_reduction <add>, %24, %cst_30 [0, 1, 2] : vector<2x8x8x8xf32> to vector<8xf32>
    %28 = vector.shape_cast %27 : vector<8xf32> to vector<1x1x1x8xf32>
    %29 = arith.mulf %24, %24 : vector<2x8x8x8xf32>
    %cst_31 = arith.constant dense<0.000000e+00> : vector<8xf32>
    %30 = vector.multi_reduction <add>, %29, %cst_31 [0, 1, 2] : vector<2x8x8x8xf32> to vector<8xf32>
    %31 = vector.shape_cast %30 : vector<8xf32> to vector<1x1x1x8xf32>
    %cst_32 = arith.constant 7.812500e-03 : f32
    %32 = vector.broadcast %cst_32 : f32 to vector<1x1x1x8xf32>
    %33 = arith.mulf %28, %32 : vector<1x1x1x8xf32>
    %cst_33 = arith.constant 7.812500e-03 : f32
    %34 = vector.broadcast %cst_33 : f32 to vector<1x1x1x8xf32>
    %35 = arith.mulf %31, %34 : vector<1x1x1x8xf32>
    %36 = arith.mulf %33, %33 : vector<1x1x1x8xf32>
    %37 = arith.subf %35, %36 : vector<1x1x1x8xf32>
    %cst_34 = arith.constant 9.99999974E-6 : f32
    %38 = vector.broadcast %cst_34 : f32 to vector<1x1x1x8xf32>
    %39 = arith.addf %37, %38 : vector<1x1x1x8xf32>
    %40 = math.rsqrt %39 : vector<1x1x1x8xf32>
    %41 = arith.mulf %25, %40 : vector<1x1x1x8xf32>
    %42 = arith.mulf %33, %41 : vector<1x1x1x8xf32>
    %43 = arith.subf %26, %42 : vector<1x1x1x8xf32>
    %44 = vector.shape_cast %41 : vector<1x1x1x8xf32> to vector<1x8xf32>
    %45 = vector.shape_cast %43 : vector<1x1x1x8xf32> to vector<1x8xf32>
    %c0_35 = arith.constant 0 : index
    %c0_36 = arith.constant 0 : index
    %46 = vector.load %arg7[%c0_35, %c0_36] : memref<2x8xf32, #tpu.memory_space<vmem>>, vector<1x8xf32>
    tpu.vector_store %arg7[%c0_35, %c0_36], %44 {strides = array<i32>} : memref<2x8xf32, #tpu.memory_space<vmem>>, vector<1x8xf32>,
    %c1_37 = arith.constant 1 : index
    %c0_38 = arith.constant 0 : index
    %47 = vector.load %arg7[%c1_37, %c0_38] : memref<2x8xf32, #tpu.memory_space<vmem>>, vector<1x8xf32>
    tpu.vector_store %arg7[%c1_37, %c0_38], %45 {strides = array<i32>} : memref<2x8xf32, #tpu.memory_space<vmem>>, vector<1x8xf32>,
    return
  }
}

</mosaic_0001>

<bundles_post_ra>
// kernel: tpu_custom_call.1
= control target key start
LH: loop header
LB: loop body
LE: loop exit
PB: predicated region body
PF: predicated region fallthrough
CT: control target
= control target key end

     0   :  { %13 = vsyncpa [#allocation3], 0  ;;  %s1484_s0 = inlined_call_operand.vmem [shape: f32[2,16,16,8], index: 0, kind: input, shape index: {}]   ;;  %s1485_s1 = inlined_call_operand.vmem [shape: f32[2,8,8,8], index: 1, kind: input, shape index: {}]   ;;  %s1486_s2 = inlined_call_operand.vmem [shape: f32[1,1,1,8], index: 2, kind: input, shape index: {}]   ;;  %s1487_s3 = inlined_call_operand.vmem [shape: f32[1,1,1,8], index: 3, kind: input, shape index: {}]   ;;  %s1488_s4 = inlined_call_operand.vmem [shape: f32[1,1,1,8], index: 4, kind: input, shape index: {}]   ;;  %s1489_s5 = inlined_call_operand.vmem [shape: f32[1,1,1,8], index: 5, kind: input, shape index: {}]   ;;  %s1490_s6 = inlined_call_operand.hbm [shape: f32[2,8], index: 6, kind: output, shape index: {0}]   ;;  %s1491_s7 = inlined_call_operand.hbm [shape: f32[2,8], index: 7, kind: output, shape index: {1}]  }
   0x1   :  { %14 = vsyncpa [#allocation5], 0  ;;  %v27_v0 = vld [vmem:[%s1484_s0] sm:$0xff]  ;;  %v28_v1 = vld [vmem:[%s1484_s0 + $0x8] sm:$0xff]  ;;  %vm93_vm0 = vcmask 64512   ;;  %vm433_vm1 = vcmask 57344  }
   0x2   :  { %v29_v2 = vld [vmem:[%s1484_s0 + $0x10] sm:$0xff]  ;;  %v30_v3 = vld [vmem:[%s1484_s0 + $0x18] sm:$0xff]  ;;  %v94_v4 = vsel %vm93_vm0, %v27_v0, 0.0  ;;  %v95_v5 = vsel %vm93_vm0, %v28_v1, 0.0  ;;  %v31_v6 = vld [vmem:[%s1484_s0 + $0x20] sm:$0xff]  ;;  %v227_v55 = vmul.f32 %v27_v0, %v27_v0  ;;  %v228_v56 = vmul.f32 %v28_v1, %v28_v1  ;;  %s637_s22 = smov [#allocation4]  }
   0x3   :  { %v96_v7 = vadd.f32 %v95_v5, %v94_v4  ;;  %v97_v8 = vsel %vm93_vm0, %v29_v2, 0.0  ;;  %v99_v9 = vsel %vm93_vm0, %v30_v3, 0.0  ;;  %v701_v10 = vld [vmem:[%s1484_s0 + $0x28] sm:$0xff]  ;;  %v101_v12 = vsel %vm93_vm0, %v31_v6, 0.0  ;;  %v707_v13 = vld [vmem:[%s1484_s0 + $0x30] sm:$0xff]  ;;  %v714_v16 = vld [vmem:[%s1484_s0 + $0x38] sm:$0xff] }
   0x4   :  { %v103_v15 = vsel %vm93_vm0, %v701_v10, 0.0  ;;  %v105_v18 = vsel %vm93_vm0, %v707_v13, 0.0  ;;  %v721_v19 = vld [vmem:[%s1484_s0 + $0x40] sm:$0xff]  ;;  %v107_v21 = vsel %vm93_vm0, %v714_v16, 0.0  ;;  %v728_v22 = vld [vmem:[%s1484_s0 + $0x48] sm:$0xff]  ;;  %v735_v25 = vld [vmem:[%s1484_s0 + $0x50] sm:$0xff]  ;;  %v229_v59 = vmul.f32 %v29_v2, %v29_v2 }
   0x5   :  { %v98_v11 = vadd.f32 %v97_v8, %v96_v7  ;;  %v109_v24 = vsel %vm93_vm0, %v721_v19, 0.0  ;;  %v111_v27 = vsel %vm93_vm0, %v728_v22, 0.0  ;;  %v742_v28 = vld [vmem:[%s1484_s0 + $0x58] sm:$0xff]  ;;  %v113_v30 = vsel %vm93_vm0, %v735_v25, 0.0  ;;  %v749_v31 = vld [vmem:[%s1484_s0 + $0x60] sm:$0xff]  ;;  %v756_v34 = vld [vmem:[%s1484_s0 + $0x68] sm:$0xff] }
   0x6   :  { %v115_v33 = vsel %vm93_vm0, %v742_v28, 0.0  ;;  %v117_v36 = vsel %vm93_vm0, %v749_v31, 0.0  ;;  %v763_v37 = vld [vmem:[%s1484_s0 + $0x70] sm:$0xff]  ;;  %v119_v39 = vsel %vm93_vm0, %v756_v34, 0.0  ;;  %v770_v40 = vld [vmem:[%s1484_s0 + $0x78] sm:$0xff]  ;;  %v777_v43 = vld [vmem:[%s1484_s0 + $0x80] sm:$0xff]  ;;  %v230_v61 = vmul.f32 %v30_v3, %v30_v3 }
   0x7   :  { %v100_v14 = vadd.f32 %v99_v9, %v98_v11  ;;  %v121_v42 = vsel %vm93_vm0, %v763_v37, 0.0  ;;  %v123_v45 = vsel %vm93_vm0, %v770_v40, 0.0  ;;  %v784_v46 = vld [vmem:[%s1484_s0 + $0x88] sm:$0xff]  ;;  %v125_v48 = vsel %vm93_vm0, %v777_v43, 0.0  ;;  %v791_v49 = vld [vmem:[%s1484_s0 + $0x90] sm:$0xff]  ;;  %v798_v52 = vld [vmem:[%s1484_s0 + $0x98] sm:$0xff] }
   0x8   :  { %v127_v51 = vsel %vm93_vm0, %v784_v46, 0.0  ;;  %v129_v54 = vsel %vm93_vm0, %v791_v49, 0.0  ;;  %v805_v57 = vld [vmem:[%s1484_s0 + $0xa0] sm:$0xff]  ;;  %v131_v60 = vsel %vm93_vm0, %v798_v52, 0.0  ;;  %v812_v62 = vld [vmem:[%s1484_s0 + $0xa8] sm:$0xff]  ;;  %v231_v1 = vmul.f32 %v31_v6, %v31_v6  ;;  %v821_v2 = vld [vmem:[%s1484_s0 + $0xb0] sm:$0xff] }
   0x9   :  { %v102_v17 = vadd.f32 %v101_v12, %v100_v14  ;;  %v133_v0 = vsel %vm93_vm0, %v805_v57, 0.0  ;;  %v291_v4 = vsel %vm93_vm0, %v227_v55, 0.0  ;;  %v292_v5 = vsel %vm93_vm0, %v228_v56, 0.0  ;;  %v832_v12 = vld [vmem:[%s1484_s0 + $0xb8] sm:$0xff]  ;;  %s571_s23 = sshll.u32 %s637_s22, 4  ;;  %s572_s23 = int_to_ptr.vmem [resolvable:$true] %s571_s23 }
   0xa   :  { %v293_v7 = vadd.f32 %v292_v5, %v291_v4  ;;  %v294_v8 = vsel %vm93_vm0, %v229_v59, 0.0  ;;  %v135_v9 = vsel %vm93_vm0, %v812_v62, 0.0  ;;  %v232_v11 = vmul.f32 %v701_v10, %v701_v10  ;;  %v842_v10 = vld [vmem:[%s1484_s0 + $0xc0] sm:$0xff]  ;;  %v941_v4 = vld [vmem:[%s1484_s0 + $0x130] sm:$0xff]  ;;  %v946_v5 = vld [vmem:[%s1484_s0 + $0x138] sm:$0xff]  ;;  %p594_p1 = scmp.lt.s32.totalorder %s572_s23, %s572_s23 }
   0xb   :  { %v104_v20 = vadd.f32 %v103_v15, %v102_v17  ;;  %v296_v6 = vsel %vm93_vm0, %v230_v61, 0.0  ;;  %v137_v17 = vsel %vm93_vm0, %v821_v2, 0.0  ;;  %v930_v61 = vld [vmem:[%s1484_s0 + $0x128] sm:$0xff]  ;;  %1502 = vst [vmem:[#allocation8_spill] sm:$0xff] %v946_v5 }
   0xc   :  { %v295_v15 = vadd.f32 %v294_v8, %v293_v7  ;;  %v237_v8 = vmul.f32 %v735_v25, %v735_v25 }
   0xd   :  { %v106_v23 = vadd.f32 %v105_v18, %v104_v20  ;;  %v233_v18 = vmul.f32 %v707_v13, %v707_v13  ;;  %v298_v20 = vsel %vm93_vm0, %v231_v1, 0.0  ;;  %v857_v13 = vld [vmem:[%s1484_s0 + $0xd8] sm:$0xff] }
   0xf   :  { %v108_v26 = vadd.f32 %v107_v21, %v106_v23  ;;  %v847_v21 = vld [vmem:[%s1484_s0 + $0xc8] sm:$0xff] }
  0x11   :  { %v110_v29 = vadd.f32 %v109_v24, %v108_v26  ;;  %v297_v24 = vadd.f32 %v296_v6, %v295_v15  ;;  %v852_v26 = vld [vmem:[%s1484_s0 + $0xd0] sm:$0xff]  ;;  %v967_v6 = vld [vmem:[%s1484_s0 + $0x148] sm:$0xff] }
  0x12   :  { %1504 = vst [vmem:[#allocation10_spill] sm:$0xff] %v967_v6 }
  0x13   :  { %v112_v32 = vadd.f32 %v111_v27, %v110_v29  ;;  %v139_v27 = vsel %vm93_vm0, %v832_v12, 0.0  ;;  %v234_v29 = vmul.f32 %v714_v16, %v714_v16  ;;  %v882_v16 = vld [vmem:[%s1484_s0 + $0xf8] sm:$0xff] }
  0x14   :  { %v936_v1 = vsel %vm93_vm0, %v882_v16, 0.0 }
  0x15   :  { %v114_v35 = vadd.f32 %v113_v30, %v112_v32  ;;  %v300_v30 = vsel %vm93_vm0, %v232_v11, 0.0  ;;  %v867_v32 = vld [vmem:[%s1484_s0 + $0xe0] sm:$0xff]  ;;  %v304_v59 = vsel %vm93_vm0, %v234_v29, 0.0 }
  0x16   :  { %v149_v55 = vsel %vm93_vm0, %v867_v32, 0.0  ;;  %v962_v11 = vld [vmem:[%s1484_s0 + $0x140] sm:$0xff] }
  0x17   :  { %v116_v38 = vadd.f32 %v115_v33, %v114_v35  ;;  %v872_v33 = vld [vmem:[%s1484_s0 + $0xe8] sm:$0xff]  ;;  %1503 = vst [vmem:[#allocation9_spill] sm:$0xff] %v962_v11 }
  0x18   :  { %v151_v56 = vsel %vm93_vm0, %v872_v33, 0.0 }
  0x19   :  { %v118_v41 = vadd.f32 %v117_v36, %v116_v38  ;;  %v299_v36 = vadd.f32 %v298_v20, %v297_v24  ;;  %v877_v38 = vld [vmem:[%s1484_s0 + $0xf0] sm:$0xff]  ;;  %v985_v20 = vld [vmem:[%s1484_s0 + $0x158] sm:$0xff]  ;;  %v993_v24 = vsel %vm93_vm0, %v930_v61, 0.0 }
  0x1a   :  { %1506 = vst [vmem:[#allocation12_spill] sm:$0xff] %v985_v20 }
  0x1b   :  { %v120_v44 = vadd.f32 %v119_v39, %v118_v41  ;;  %v141_v39 = vsel %vm93_vm0, %v842_v10, 0.0  ;;  %v143_v41 = vsel %vm93_vm0, %v847_v21, 0.0 }
  0x1d   :  { %v122_v47 = vadd.f32 %v121_v42, %v120_v44  ;;  %v235_v42 = vmul.f32 %v721_v19, %v721_v19  ;;  %v302_v44 = vsel %vm93_vm0, %v233_v18, 0.0  ;;  %v301_v19 = vadd.f32 %v300_v30, %v299_v36  ;;  %v980_v18 = vld [vmem:[%s1484_s0 + $0x150] sm:$0xff]  ;;  %v1001_v30 = vld [vmem:[%s1484_s0 + $0x160] sm:$0xff] }
  0x1e   :  { %1505 = vst [vmem:[#allocation11_spill] sm:$0xff] %v980_v18  ;;  %1507 = vst [vmem:[#allocation13_spill] sm:$0xff] %v1001_v30 }
  0x1f   :  { %v124_v50 = vadd.f32 %v123_v45, %v122_v47  ;;  %v894_v45 = vld [vmem:[%s1484_s0 + $0x100] sm:$0xff]  ;;  %v899_v47 = vld [vmem:[%s1484_s0 + $0x108] sm:$0xff] }
  0x20   :  { %v954_v7 = vsel %vm93_vm0, %v899_v47, 0.0 }
  0x21   :  { %v126_v53 = vadd.f32 %v125_v48, %v124_v50  ;;  %v145_v50 = vsel %vm93_vm0, %v852_v26, 0.0 }
  0x23   :  { %v128_v58 = vadd.f32 %v127_v51, %v126_v53  ;;  %v147_v51 = vsel %vm93_vm0, %v857_v13, 0.0  ;;  %v908_v53 = vld [vmem:[%s1484_s0 + $0x110] sm:$0xff] }
  0x24   :  { %v971_v15 = vsel %vm93_vm0, %v908_v53, 0.0 }
  0x25   :  { %v130_v63 = vadd.f32 %v129_v54, %v128_v58  ;;  %v913_v54 = vld [vmem:[%s1484_s0 + $0x118] sm:$0xff]  ;;  %v236_v58 = vmul.f32 %v728_v22, %v728_v22  ;;  %v303_v22 = vadd.f32 %v302_v44, %v301_v19  ;;  %v239_v19 = vmul.f32 %v749_v31, %v749_v31 }
  0x26   :  { %v975_v25 = vsel %vm93_vm0, %v913_v54, 0.0  ;;  %v1024_v44 = vld [vmem:[%s1484_s0 + $0x178] sm:$0xff]  ;;  %v1052_v31 = vsel %vm93_vm0, %v1001_v30, 0.0  ;;  %v244_v30 = vmul.f32 %v784_v46, %v784_v46  ;;  %v440_v46 = vld [vmem:[%s1485_s1 + $0x20] sm:$0xff] }
  0x27   :  { %v132_v3 = vadd.f32 %v131_v60, %v130_v63  ;;  %v925_v60 = vld [vmem:[%s1484_s0 + $0x120] sm:$0xff]  ;;  %v308_v29 = vsel %vm93_vm0, %v236_v58, 0.0  ;;  %1510 = vst [vmem:[#allocation16_spill] sm:$0xff] %v1024_v44  ;;  %v310_v58 = vsel %vm93_vm0, %v237_v8, 0.0 }
  0x29   :  { %v134_v14 = vadd.f32 %v133_v0, %v132_v3  ;;  %v153_v0 = vsel %vm93_vm0, %v877_v38, 0.0  ;;  %v950_v3 = vsel %vm93_vm0, %v894_v45, 0.0 }
  0x2b   :  { %v136_v23 = vadd.f32 %v135_v9, %v134_v14  ;;  %v306_v9 = vsel %vm93_vm0, %v235_v42, 0.0  ;;  %v1019_v42 = vld [vmem:[%s1484_s0 + $0x170] sm:$0xff] }
  0x2c   :  { %1509 = vst [vmem:[#allocation15_spill] sm:$0xff] %v1019_v42 }
  0x2d   :  { %v138_v35 = vadd.f32 %v137_v17, %v136_v23  ;;  %v305_v17 = vadd.f32 %v304_v59, %v303_v22  ;;  %v989_v23 = vsel %vm93_vm0, %v925_v60, 0.0  ;;  %v1040_v59 = vld [vmem:[%s1484_s0 + $0x180] sm:$0xff]  ;;  %v1044_v22 = vsel %vm93_vm0, %v980_v18, 0.0 }
  0x2e   :  { %1511 = vst [vmem:[#allocation17_spill] sm:$0xff] %v1040_v59  ;;  %v1063_v18 = vsel %vm93_vm0, %v1019_v42, 0.0  ;;  %v243_v42 = vmul.f32 %v777_v43, %v777_v43  ;;  %v245_v43 = vmul.f32 %v791_v49, %v791_v49  ;;  %v248_v49 = vmul.f32 %v812_v62, %v812_v62 }
  0x2f   :  { %v140_v48 = vadd.f32 %v139_v27, %v138_v35  ;;  %v238_v27 = vmul.f32 %v742_v28, %v742_v28  ;;  %v1006_v35 = vld [vmem:[%s1484_s0 + $0x168] sm:$0xff]  ;;  %v1014_v28 = vsel %vm93_vm0, %v946_v5, 0.0 }
  0x30   :  { %1508 = vst [vmem:[#allocation14_spill] sm:$0xff] %v1006_v35  ;;  %v1056_v8 = vsel %vm93_vm0, %v1006_v35, 0.0  ;;  %v436_v35 = vld [vmem:[%s1485_s1] sm:$0xff] }
  0x31   :  { %v142_v63 = vadd.f32 %v141_v39, %v140_v48  ;;  %v1010_v39 = vsel %vm93_vm0, %v941_v4, 0.0  ;;  %v1028_v48 = vsel %vm93_vm0, %v962_v11, 0.0 }
  0x33   :  { %v144_v14 = vadd.f32 %v143_v41, %v142_v63  ;;  %v307_v41 = vadd.f32 %v306_v9, %v305_v17  ;;  %v1048_v9 = vsel %vm93_vm0, %v985_v20, 0.0  ;;  %v312_v17 = vsel %vm93_vm0, %v238_v27, 0.0 }
  0x34   :  { %v1080_v27 = vsel %vm93_vm0, %v1040_v59, 0.0  ;;  %v439_v59 = vld [vmem:[%s1485_s1 + $0x18] sm:$0xff] }
  0x35   :  { %v146_v36 = vadd.f32 %v145_v50, %v144_v14  ;;  %v1032_v50 = vsel %vm93_vm0, %v967_v6, 0.0  ;;  %v309_v14 = vadd.f32 %v308_v29, %v307_v41  ;;  %v1067_v29 = vsel %vm93_vm0, %v1024_v44, 0.0 }
  0x36   :  { %v459_v5 = vsel %vm93_vm0, %v439_v59, 0.0 }
  0x37   :  { %v148_v63 = vadd.f32 %v147_v51, %v146_v36  ;;  %v240_v51 = vmul.f32 %v756_v34, %v756_v34  ;;  %v311_v41 = vadd.f32 %v310_v58, %v309_v14  ;;  %v437_v34 = vld [vmem:[%s1485_s1 + $0x8] sm:$0xff]  ;;  %v242_v58 = vmul.f32 %v770_v40, %v770_v40 }
  0x38   :  { %v314_v14 = vsel %vm93_vm0, %v239_v19, 0.0  ;;  %v455_v40 = vsel %vm93_vm0, %v437_v34, 0.0 }
  0x39   :  { %v150_v36 = vadd.f32 %v149_v55, %v148_v63  ;;  %v438_v55 = vld [vmem:[%s1485_s1 + $0x10] sm:$0xff]  ;;  %v241_v63 = vmul.f32 %v763_v37, %v763_v37  ;;  %v313_v20 = vadd.f32 %v312_v17, %v311_v41  ;;  %v316_v6 = vsel %vm93_vm0, %v240_v51, 0.0 }
  0x3a   :  { %v454_v37 = vsel %vm93_vm0, %v436_v35, 0.0  ;;  %v457_v19 = vsel %vm93_vm0, %v438_v55, 0.0  ;;  %v246_v41 = vmul.f32 %v798_v52, %v798_v52  ;;  %v247_v51 = vmul.f32 %v805_v57, %v805_v57 }
  0x3b   :  { %v152_v44 = vadd.f32 %v151_v56, %v150_v36  ;;  %v315_v36 = vadd.f32 %v314_v14, %v313_v20  ;;  %v456_v17 = vadd.f32 %v455_v40, %v454_v37  ;;  %v318_v11 = vsel %vm93_vm0, %v241_v63, 0.0 }
  0x3c   :  { %v1117_v52 = vmul.f32 %v821_v2, %v821_v2  ;;  %v1121_v57 = vmul.f32 %v832_v12, %v832_v12  ;;  %v320_v63 = vsel %vm93_vm0, %v242_v58, 0.0  ;;  %v442_v2 = vld [vmem:[%s1485_s1 + $0x30] sm:$0xff]  ;;  %v1135_v12 = vmul.f32 %v847_v21, %v847_v21  ;;  %v443_v21 = vld [vmem:[%s1485_s1 + $0x38] sm:$0xff] }
  0x3d   :  { %v154_v56 = vadd.f32 %v153_v0, %v152_v44  ;;  %v317_v20 = vadd.f32 %v316_v6, %v315_v36  ;;  %v441_v44 = vld [vmem:[%s1485_s1 + $0x28] sm:$0xff]  ;;  %v458_v14 = vadd.f32 %v457_v19, %v456_v17  ;;  %v1128_v6 = vmul.f32 %v842_v10, %v842_v10 }
  0x3e   :  { %v1139_v58 = vmul.f32 %v852_v26, %v852_v26  ;;  %v463_v19 = vsel %vm93_vm0, %v441_v44, 0.0  ;;  %v1153_v26 = vmul.f32 %v867_v32, %v867_v32  ;;  %v465_v36 = vsel %vm93_vm0, %v442_v2, 0.0 }
  0x3f   :  { %v156_v0 = vadd.f32 %v936_v1, %v154_v56  ;;  %v461_v1 = vsel %vm93_vm0, %v440_v46, 0.0  ;;  %v319_v37 = vadd.f32 %v318_v11, %v317_v20  ;;  %v460_v40 = vadd.f32 %v459_v5, %v458_v14 }
  0x40   :  { %v1146_v11 = vmul.f32 %v857_v13, %v857_v13  ;;  %v491_v17 = vmul.f32 %v436_v35, %v436_v35  ;;  %v444_v13 = vld [vmem:[%s1485_s1 + $0x40] sm:$0xff]  ;;  %v492_v14 = vmul.f32 %v437_v34, %v437_v34  ;;  %v467_v32 = vsel %vm93_vm0, %v443_v21, 0.0 }
  0x41   :  { %v158_v62 = vadd.f32 %v950_v3, %v156_v0  ;;  %v322_v3 = vsel %vm93_vm0, %v243_v42, 0.0  ;;  %v321_v56 = vadd.f32 %v320_v63, %v319_v37  ;;  %v462_v5 = vadd.f32 %v461_v1, %v460_v40 }
  0x42   :  { %v324_v42 = vsel %vm93_vm0, %v244_v30, 0.0  ;;  %v326_v63 = vsel %vm93_vm0, %v245_v43, 0.0  ;;  %v328_v1 = vsel %vm93_vm0, %v246_v41, 0.0  ;;  %v494_v40 = vmul.f32 %v439_v59, %v439_v59 }
  0x43   :  { %v160_v10 = vadd.f32 %v954_v7, %v158_v62  ;;  %v323_v0 = vadd.f32 %v322_v3, %v321_v56  ;;  %v464_v20 = vadd.f32 %v463_v19, %v462_v5  ;;  %v493_v62 = vmul.f32 %v438_v55, %v438_v55 }
  0x44   :  { %v330_v3 = vsel %vm93_vm0, %v247_v51, 0.0  ;;  %v469_v34 = vsel %vm93_vm0, %v444_v13, 0.0  ;;  %v495_v19 = vmul.f32 %v440_v46, %v440_v46  ;;  %v507_v43 = vsel %vm93_vm0, %v491_v17, 0.0 }
  0x45   :  { %v162_v7 = vadd.f32 %v971_v15, %v160_v10  ;;  %v325_v37 = vadd.f32 %v324_v42, %v323_v0  ;;  %v445_v15 = vld [vmem:[%s1485_s1 + $0x48] sm:$0xff]  ;;  %v466_v35 = vadd.f32 %v465_v36, %v464_v20  ;;  %v508_v56 = vsel %vm93_vm0, %v492_v14, 0.0 }
  0x46   :  { %v471_v5 = vsel %vm93_vm0, %v445_v15, 0.0  ;;  %v496_v59 = vmul.f32 %v441_v44, %v441_v44  ;;  %v509_v42 = vadd.f32 %v508_v56, %v507_v43  ;;  %v510_v51 = vsel %vm93_vm0, %v493_v62, 0.0 }
  0x47   :  { %v164_v30 = vadd.f32 %v975_v25, %v162_v7  ;;  %v327_v10 = vadd.f32 %v326_v63, %v325_v37  ;;  %v446_v25 = vld [vmem:[%s1485_s1 + $0x50] sm:$0xff]  ;;  %v468_v55 = vadd.f32 %v467_v32, %v466_v35  ;;  %v512_v7 = vsel %vm93_vm0, %v494_v40, 0.0 }
  0x48   :  { %v332_v0 = vsel %vm93_vm0, %v248_v49, 0.0  ;;  %v473_v20 = vsel %vm93_vm0, %v446_v25, 0.0  ;;  %v497_v14 = vmul.f32 %v442_v2, %v442_v2  ;;  %v511_v63 = vadd.f32 %v510_v51, %v509_v42 }
  0x49   :  { %v166_v41 = vadd.f32 %v989_v23, %v164_v30  ;;  %v329_v36 = vadd.f32 %v328_v1, %v327_v10  ;;  %v447_v23 = vld [vmem:[%s1485_s1 + $0x58] sm:$0xff]  ;;  %v470_v17 = vadd.f32 %v469_v34, %v468_v55  ;;  %v514_v62 = vsel %vm93_vm0, %v495_v19, 0.0 }
  0x4a   :  { %v334_v30 = vsel %vm93_vm0, %v1117_v52, 0.0  ;;  %v475_v37 = vsel %vm93_vm0, %v447_v23, 0.0  ;;  %v498_v49 = vmul.f32 %v443_v21, %v443_v21  ;;  %v513_v35 = vadd.f32 %v512_v7, %v511_v63 }
  0x4b   :  { %v168_v46 = vadd.f32 %v993_v24, %v166_v41  ;;  %v331_v32 = vadd.f32 %v330_v3, %v329_v36  ;;  %v448_v24 = vld [vmem:[%s1485_s1 + $0x60] sm:$0xff]  ;;  %v472_v1 = vadd.f32 %v471_v5, %v470_v17  ;;  %v516_v34 = vsel %vm93_vm0, %v496_v59, 0.0 }
  0x4c   :  { %v336_v19 = vsel %vm93_vm0, %v1121_v57, 0.0  ;;  %v477_v43 = vsel %vm93_vm0, %v448_v24, 0.0  ;;  %v499_v52 = vmul.f32 %v444_v13, %v444_v13  ;;  %v515_v41 = vadd.f32 %v514_v62, %v513_v35 }
  0x4d   :  { %v170_v44 = vadd.f32 %v1010_v39, %v168_v46  ;;  %v333_v40 = vadd.f32 %v332_v0, %v331_v32  ;;  %v449_v39 = vld [vmem:[%s1485_s1 + $0x68] sm:$0xff]  ;;  %v474_v3 = vadd.f32 %v473_v20, %v472_v1  ;;  %v518_v56 = vsel %vm93_vm0, %v497_v14, 0.0 }
  0x4e   :  { %v338_v5 = vsel %vm93_vm0, %v1128_v6, 0.0  ;;  %v479_v59 = vsel %vm93_vm0, %v449_v39, 0.0  ;;  %v500_v57 = vmul.f32 %v445_v15, %v445_v15  ;;  %v517_v42 = vadd.f32 %v516_v34, %v515_v41 }
  0x4f   :  { %v172_v2 = vadd.f32 %v1014_v28, %v170_v44  ;;  %v335_v10 = vadd.f32 %v334_v30, %v333_v40  ;;  %v450_v28 = vld [vmem:[%s1485_s1 + $0x70] sm:$0xff]  ;;  %v476_v55 = vadd.f32 %v475_v37, %v474_v3  ;;  %v520_v36 = vsel %vm93_vm0, %v498_v49, 0.0 }
  0x50   :  { %v340_v17 = vsel %vm93_vm0, %v1135_v12, 0.0  ;;  %v481_v7 = vsel %vm93_vm0, %v450_v28, 0.0  ;;  %v501_v6 = vmul.f32 %v446_v25, %v446_v25  ;;  %v519_v0 = vadd.f32 %v518_v56, %v517_v42 }
  0x51   :  { %v174_v21 = vadd.f32 %v1028_v48, %v172_v2  ;;  %v337_v51 = vadd.f32 %v336_v19, %v335_v10  ;;  %v451_v48 = vld [vmem:[%s1485_s1 + $0x78] sm:$0xff]  ;;  %v478_v46 = vadd.f32 %v477_v43, %v476_v55  ;;  %v342_v63 = vsel %vm93_vm0, %v1139_v58, 0.0  ;;  %v1249_v55 = vld [vmem:[%s1484_s0 + $0x190] sm:$0xff] }
  0x52   :  { %v483_v44 = vsel %vm93_vm0, %v451_v48, 0.0  ;;  %v502_v32 = vmul.f32 %v447_v23, %v447_v23  ;;  %v521_v1 = vadd.f32 %v520_v36, %v519_v0  ;;  %v524_v25 = vsel %vm93_vm0, %v500_v57, 0.0 }
  0x53   :  { %v176_v13 = vadd.f32 %v1032_v50, %v174_v21  ;;  %v339_v20 = vadd.f32 %v338_v5, %v337_v51  ;;  %v480_v14 = vadd.f32 %v479_v59, %v478_v46  ;;  %v522_v50 = vsel %vm93_vm0, %v499_v52, 0.0 }
  0x54   :  { %v344_v37 = vsel %vm93_vm0, %v1146_v11, 0.0  ;;  %v503_v49 = vmul.f32 %v448_v24, %v448_v24  ;;  %v523_v35 = vadd.f32 %v522_v50, %v521_v1  ;;  %v526_v23 = vsel %vm93_vm0, %v501_v6, 0.0 }
  0x55   :  { %v178_v15 = vadd.f32 %v1044_v22, %v176_v13  ;;  %v341_v12 = vadd.f32 %v340_v17, %v339_v20  ;;  %v482_v30 = vadd.f32 %v481_v7, %v480_v14  ;;  %v256_v22 = vmul.f32 %v872_v33, %v872_v33 }
  0x56   :  { %v346_v3 = vsel %vm93_vm0, %v1153_v26, 0.0  ;;  %v504_v34 = vmul.f32 %v449_v39, %v449_v39  ;;  %v525_v19 = vadd.f32 %v524_v25, %v523_v35  ;;  %v528_v24 = vsel %vm93_vm0, %v502_v32, 0.0  ;;  %v1294_v25 = vld [vmem:[%s1484_s0 + $0x1b0] sm:$0xff] }
  0x57   :  { %v180_v62 = vadd.f32 %v1048_v9, %v178_v15  ;;  %v343_v2 = vadd.f32 %v342_v63, %v341_v12  ;;  %v484_v40 = vadd.f32 %v483_v44, %v482_v30  ;;  %v257_v9 = vmul.f32 %v877_v38, %v877_v38  ;;  %v1242_v38 = vld [vmem:[%s1484_s0 + $0x188] sm:$0xff] }
  0x58   :  { %v348_v52 = vsel %vm93_vm0, %v256_v22, 0.0  ;;  %v505_v41 = vmul.f32 %v450_v28, %v450_v28  ;;  %v527_v21 = vadd.f32 %v526_v23, %v525_v19  ;;  %v530_v10 = vsel %vm93_vm0, %v503_v49, 0.0 }
  0x59   :  { %v182_v58 = vadd.f32 %v1052_v31, %v180_v62  ;;  %v345_v43 = vadd.f32 %v344_v37, %v343_v2  ;;  %v485_v11 = vrot.slane %v484_v40, 4  ;;  %v258_v31 = vmul.f32 %v882_v16, %v882_v16 }
  0x5a   :  { %v259_v16 = vmul.f32 %v894_v45, %v894_v45  ;;  %v350_v28 = vsel %vm93_vm0, %v257_v9, 0.0  ;;  %v506_v56 = vmul.f32 %v451_v48, %v451_v48  ;;  %v529_v5 = vadd.f32 %v528_v24, %v527_v21  ;;  %v1264_v45 = vld [vmem:[%s1484_s0 + $0x198] sm:$0xff] }
  0x5b   :  { %v184_v33 = vadd.f32 %v1056_v8, %v182_v58  ;;  %v347_v39 = vadd.f32 %v346_v3, %v345_v43  ;;  %v486_v8 = vadd.f32 %v485_v11, %v484_v40  ;;  %v532_v42 = vsel %vm93_vm0, %v504_v34, 0.0  ;;  %v1307_v3 = vld [vmem:[%s1484_s0 + $0x1b8] sm:$0xff] }
  0x5c   :  { %v191_v13 = vsel %vm93_vm0, %v1242_v38, 0.0  ;;  %v260_v51 = vmul.f32 %v899_v47, %v899_v47  ;;  %v352_v46 = vsel %vm93_vm0, %v258_v31, 0.0  ;;  %v531_v36 = vadd.f32 %v530_v10, %v529_v5  ;;  %v1273_v47 = vld [vmem:[%s1484_s0 + $0x1a0] sm:$0xff] }
  0x5d   :  { %v186_v26 = vadd.f32 %v1063_v18, %v184_v33  ;;  %v349_v57 = vadd.f32 %v348_v52, %v347_v39  ;;  %v487_v18 = vrot.slane %v486_v8, 2  ;;  %v193_v48 = vsel %vm93_vm0, %v1249_v55, 0.0 }
  0x5e   :  { %v534_v7 = vsel %vm93_vm0, %v505_v41, 0.0  ;;  %v261_v6 = vmul.f32 %v908_v53, %v908_v53  ;;  %v354_v0 = vsel %vm93_vm0, %v259_v16, 0.0  ;;  %v533_v20 = vadd.f32 %v532_v42, %v531_v36  ;;  %v1287_v53 = vld [vmem:[%s1484_s0 + $0x1a8] sm:$0xff] }
  0x5f   :  { %v188_v59 = vadd.f32 %v1067_v29, %v186_v26  ;;  %v351_v17 = vadd.f32 %v350_v28, %v349_v57  ;;  %v488_v15 = vadd.f32 %v487_v18, %v486_v8  ;;  %v536_v50 = vsel %vm93_vm0, %v506_v56, 0.0  ;;  %v1512_v41 = vld [vmem:[#allocation8_spill] sm:$0xff]  ;;  %v1513_v16 = vld [vmem:[#allocation9_spill] sm:$0xff] }
  0x60   :  { %v195_v63 = vsel %vm93_vm0, %v1264_v45, 0.0  ;;  %v262_v44 = vmul.f32 %v913_v54, %v913_v54  ;;  %v356_v32 = vsel %vm93_vm0, %v260_v51, 0.0  ;;  %v535_v1 = vadd.f32 %v534_v7, %v533_v20  ;;  %v1322_v8 = vld [vmem:[%s1484_s0 + $0x1c0] sm:$0xff] }
  0x61   :  { %v190_v29 = vadd.f32 %v1080_v27, %v188_v59  ;;  %v353_v27 = vadd.f32 %v352_v46, %v351_v17  ;;  %v197_v12 = vsel %vm93_vm0, %v1273_v47, 0.0  ;;  %v263_v54 = vmul.f32 %v925_v60, %v925_v60  ;;  %v1515_v17 = vld [vmem:[#allocation11_spill] sm:$0xff] }
  0x62   :  { %v358_v22 = vsel %vm93_vm0, %v261_v6, 0.0  ;;  %v489_v37 = vrot.slane %v488_v15, 1  ;;  %v537_v49 = vadd.f32 %v536_v50, %v535_v1  ;;  %v199_v2 = vsel %vm93_vm0, %v1287_v53, 0.0  ;;  %v1516_v50 = vld [vmem:[#allocation12_spill] sm:$0xff]  ;;  %v1352_v1 = vld [vmem:[%s1484_s0 + $0x1d0] sm:$0xff] }
  0x63   :  { %v192_v14 = vadd.f32 %v191_v13, %v190_v29  ;;  %v355_v30 = vadd.f32 %v354_v0, %v353_v27  ;;  %v264_v40 = vmul.f32 %v930_v61, %v930_v61  ;;  %v360_v23 = vsel %vm93_vm0, %v262_v44, 0.0  ;;  %v1514_v13 = vld [vmem:[#allocation10_spill] sm:$0xff]  ;;  %v1337_v29 = vld [vmem:[%s1484_s0 + $0x1c8] sm:$0xff] }
  0x64   :  { %v538_v9 = vrot.slane %v537_v49, 4  ;;  %v201_v34 = vsel %vm93_vm0, %v1294_v25, 0.0  ;;  %v265_v33 = vmul.f32 %v941_v4, %v941_v4  ;;  %v362_v43 = vsel %vm93_vm0, %v263_v54, 0.0 }
  0x65   :  { %v194_v62 = vadd.f32 %v193_v48, %v192_v14  ;;  %v357_v58 = vadd.f32 %v356_v32, %v355_v30  ;;  %v490_v11 = vadd.f32 %v489_v37, %v488_v15  ;;  %v203_v52 = vsel %vm93_vm0, %v1307_v3, 0.0 }
  0x66   :  { %v539_v61 = vadd.f32 %v538_v9, %v537_v49  ;;  %v266_v21 = vmul.f32 %v1512_v41, %v1512_v41  ;;  %v364_v26 = vsel %vm93_vm0, %v264_v40, 0.0  ;;  %v267_v28 = vmul.f32 %v1513_v16, %v1513_v16  ;;  %v1365_v9 = vld [vmem:[%s1484_s0 + $0x1d8] sm:$0xff]  ;;  %v1378_v41 = vld [vmem:[%s1484_s0 + $0x1e0] sm:$0xff] }
  0x67   :  { %v196_v35 = vadd.f32 %v195_v63, %v194_v62  ;;  %v359_v19 = vadd.f32 %v358_v22, %v357_v58  ;;  %v366_v56 = vsel %vm93_vm0, %v265_v33, 0.0  ;;  %v1327_v59 = vmul.f32 0.0078125, %v490_v11  ;;  %v1518_v58 = vld [vmem:[#allocation14_spill] sm:$0xff] }
  0x68   :  { %v540_v39 = vrot.slane %v539_v61, 2  ;;  %v205_v42 = vsel %vm93_vm0, %v1322_v8, 0.0  ;;  %v268_v51 = vmul.f32 %v1514_v13, %v1514_v13  ;;  %v368_v46 = vsel %vm93_vm0, %v266_v21, 0.0 }
  0x69   :  { %v198_v60 = vadd.f32 %v197_v12, %v196_v35  ;;  %v361_v31 = vadd.f32 %v360_v23, %v359_v19  ;;  %v269_v7 = vmul.f32 %v1515_v17, %v1515_v17  ;;  %v370_v6 = vsel %vm93_vm0, %v267_v28, 0.0  ;;  %v1517_v12 = vld [vmem:[#allocation13_spill] sm:$0xff] }
  0x6a   :  { %v541_v5 = vadd.f32 %v540_v39, %v539_v61  ;;  %v546_v15 = vmul.f32 %v1327_v59, %v1327_v59  ;;  %v207_v27 = vsel %vm93_vm0, %v1337_v29, 0.0  ;;  %v270_v63 = vmul.f32 %v1516_v50, %v1516_v50 }
  0x6b   :  { %v200_v24 = vadd.f32 %v199_v2, %v198_v60  ;;  %v363_v10 = vadd.f32 %v362_v43, %v361_v31  ;;  %v372_v44 = vsel %vm93_vm0, %v268_v51, 0.0  ;;  %v271_v30 = vmul.f32 %v1517_v12, %v1517_v12  ;;  %v452_v51 = vld [vmem:[%s1488_s4] sm:$0x1] }
  0x6c   :  { %v542_v36 = vrot.slane %v541_v5, 1  ;;  %v374_v54 = vsel %vm93_vm0, %v269_v7, 0.0  ;;  %v209_v35 = vsel %vm93_vm0, %v1352_v1, 0.0  ;;  %v272_v2 = vmul.f32 %v1518_v58, %v1518_v58 }
  0x6d   :  { %v202_v4 = vadd.f32 %v201_v34, %v200_v24  ;;  %v365_v18 = vadd.f32 %v364_v26, %v363_v10  ;;  %v376_v40 = vsel %vm93_vm0, %v270_v63, 0.0  ;;  %v1519_v34 = vld [vmem:[#allocation15_spill] sm:$0xff]  ;;  %v378_v33 = vsel %vm93_vm0, %v271_v30, 0.0  ;;  %v1520_v24 = vld [vmem:[#allocation16_spill] sm:$0xff]  ;;  %v1521_v26 = vld [vmem:[#allocation17_spill] sm:$0xff] }
  0x6e   :  { %v543_v0 = vadd.f32 %v542_v36, %v541_v5  ;;  %v273_v19 = vmul.f32 %v1519_v34, %v1519_v34  ;;  %v211_v61 = vsel %vm93_vm0, %v1365_v9, 0.0  ;;  %v274_v31 = vmul.f32 %v1520_v24, %v1520_v24 }
  0x6f   :  { %v204_v57 = vadd.f32 %v203_v52, %v202_v4  ;;  %v367_v48 = vadd.f32 %v366_v56, %v365_v18  ;;  %v380_v52 = vsel %vm93_vm0, %v272_v2, 0.0  ;;  %v275_v39 = vmul.f32 %v1521_v26, %v1521_v26 }
  0x70   :  { %v545_v32 = vmul.f32 0.0078125, %v543_v0  ;;  %v382_v4 = vsel %vm93_vm0, %v273_v19, 0.0  ;;  %v213_v28 = vsel %vm93_vm0, %v1378_v41, 0.0  ;;  %v276_v56 = vmul.f32 %v1242_v38, %v1242_v38 }
  0x71   :  { %v206_v20 = vadd.f32 %v205_v42, %v204_v57  ;;  %v369_v14 = vadd.f32 %v368_v46, %v367_v48  ;;  %v384_v5 = vsel %vm93_vm0, %v274_v31, 0.0  ;;  %v1391_v57 = vld [vmem:[%s1484_s0 + $0x1e8] sm:$0xff]  ;;  %v277_v42 = vmul.f32 %v1249_v55, %v1249_v55  ;;  %v89_v55 = vld [vmem:[%s1484_s0 + $0x1f0] sm:$0xff] }
  0x72   :  { %v547_v22 = vsub.f32 %v545_v32, %v546_v15  ;;  %v386_v13 = vsel %vm93_vm0, %v275_v39, 0.0  ;;  %v215_v48 = vsel %vm93_vm0, %v1391_v57, 0.0  ;;  %v278_v17 = vmul.f32 %v1264_v45, %v1264_v45  ;;  %v90_v32 = vld [vmem:[%s1484_s0 + $0x1f8] sm:$0xff]  ;;  %s589_s0 = scalar_lea.vmem %s572_s23, 32 }
  0x73   :  { %v371_v62 = vadd.f32 %v370_v6, %v369_v14  ;;  %v208_v37 = vadd.f32 %v207_v27, %v206_v20  ;;  %v388_v7 = vsel %vm93_vm0, %v276_v56, 0.0  ;;  %v279_v15 = vmul.f32 %v1273_v47, %v1273_v47  ;;  %v453_v14 = vld [vmem:[%s1489_s5] sm:$0x1]  ;;  %p590_p0 = scmp.ne.s32.totalorder %s572_s23, %s589_s0  ;;  %p595_p2 = scmp.lt.s32.totalorder %s589_s0, %s589_s0 }
  0x74   :  { %v548_v23 = vadd.f32 1e-05, %v547_v22  ;;  %v390_v20 = vsel %vm93_vm0, %v277_v42, 0.0  ;;  %v217_v63 = vsel %vm93_vm0, %v89_v55, 0.0  ;;  %v392_v47 = vsel %vm93_vm0, %v278_v17, 0.0 }
  0x75   :  { %v373_v49 = vadd.f32 %v372_v44, %v371_v62  ;;  %v210_v43 = vadd.f32 %v209_v35, %v208_v37  ;;  %v280_v44 = vmul.f32 %v1287_v53, %v1287_v53  ;;  %v281_v30 = vmul.f32 %v1294_v25, %v1294_v25  ;;  %p596_p3 = por %p595_p2, %p594_p1 }
  0x76   :  { %585 = vrsqrt.f32 %v548_v23  ;;  %v219_v53 = vsel %vm93_vm0, %v90_v32, 0.0  ;;  %v282_v37 = vmul.f32 %v1307_v3, %v1307_v3 }
  0x77   :  { %v375_v60 = vadd.f32 %v374_v54, %v373_v49  ;;  %v212_v10 = vadd.f32 %v211_v61, %v210_v43  ;;  %v396_v49 = vsel %vm93_vm0, %v280_v44, 0.0  ;;  %p597_p4 = pnand %p596_p3, %p590_p0 }
  0x79   :  { %v377_v11 = vadd.f32 %v376_v40, %v375_v60  ;;  %v214_v46 = vadd.f32 %v213_v28, %v212_v10 }
  0x7b   :  { %v379_v21 = vadd.f32 %v378_v33, %v377_v11  ;;  %v216_v45 = vadd.f32 %v215_v48, %v214_v46 }
  0x7d   :  { %v381_v16 = vadd.f32 %v380_v52, %v379_v21  ;;  %v218_v54 = vadd.f32 %v217_v63, %v216_v45 }
  0x7f   :  { %v383_v18 = vadd.f32 %v382_v4, %v381_v16 }
  0x80   :  { %v586_v38 = vpop.eup %585 }
  0x81   :  { %v385_v36 = vadd.f32 %v384_v5, %v383_v18  ;;  %v550_v0 = vmul.f32 %v586_v38, %v452_v51 }
  0x83   :  { %v387_v6 = vadd.f32 %v386_v13, %v385_v36  ;;  %v551_v50 = vmul.f32 %v550_v0, %v1327_v59  ;;  %553 = vst.msk [vmem:[#allocation4] sm:$0x1] %vm433_vm1, %v550_v0  ;;  %v394_v59 = vsel %vm93_vm0, %v279_v15, 0.0 }
  0x85   :  { %v389_v27 = vadd.f32 %v388_v7, %v387_v6  ;;  %v552_v12 = vsub.f32 %v453_v14, %v551_v50 }
  0x87   :  { %v391_v62 = vadd.f32 %v390_v20, %v389_v27  ;;  %554 = vst.msk [vmem:[#allocation4 + $0x1] sm:$0x1] %vm433_vm1, %v552_v12 }
  0x89   :  { %v393_v22 = vadd.f32 %v392_v47, %v391_v62 }
  0x8a   :  { %600 = shalt.err (!%p597_p4)
}
  0x8b   :  { %s601_s27 = scalar_lea.hbm %s1491_s7, 32 }
  0x8c   :  { %p602_p5 = scmp.ne.s32.totalorder %s1491_s7, %s601_s27  ;;  %p605_p6 = scmp.lt.u32.totalorder %s601_s27, %s1491_s7 }
  0x8e   :  { %p607_p7 = pnand %p605_p6, %p602_p5 }
  0x90   :  { %610 = shalt.err (!%p607_p7)
}
  0x91   :  { %574 = dma.vmem_to_hbm [thread:$0]  %s572_s23, 32, %s1491_s7, [#allocation5]   ;;  %v395_v25 = vadd.f32 %v394_v59, %v393_v22  ;;  %v283_v3 = vmul.f32 %v1322_v8, %v1322_v8  ;;  %v398_v35 = vsel %vm93_vm0, %v281_v30, 0.0  ;;  %v220_v58 = vadd.f32 %v219_v53, %v218_v54  ;;  %v91_v45 = vld [vmem:[%s1486_s2] sm:$0x1] }
  0x92   :  { %v284_v40 = vmul.f32 %v1337_v29, %v1337_v29  ;;  %v400_v23 = vsel %vm93_vm0, %v282_v37, 0.0  ;;  %v285_v34 = vmul.f32 %v1352_v1, %v1352_v1  ;;  %v286_v8 = vmul.f32 %v1365_v9, %v1365_v9  ;;  %v92_v63 = vld [vmem:[%s1487_s3] sm:$0x1]  ;;  %s638_s14 = smov [#allocation2]  }
  0x93   :  { %v397_v2 = vadd.f32 %v396_v49, %v395_v25  ;;  %v402_v19 = vsel %vm93_vm0, %v283_v3, 0.0  ;;  %v221_v33 = vrot.slane %v220_v58, 4  ;;  %v287_v24 = vmul.f32 %v1378_v41, %v1378_v41  ;;  %s561_s15 = sshll.u32 %s638_s14, 4  ;;  %s562_s15 = int_to_ptr.vmem [resolvable:$true] %s561_s15 }
  0x94   :  { %v404_v11 = vsel %vm93_vm0, %v284_v40, 0.0  ;;  %v406_v29 = vsel %vm93_vm0, %v285_v34, 0.0  ;;  %v288_v1 = vmul.f32 %v1391_v57, %v1391_v57  ;;  %v408_v21 = vsel %vm93_vm0, %v286_v8, 0.0  ;;  %s611_s1 = scalar_lea.vmem %s562_s15, 32  ;;  %p616_p9 = scmp.lt.s32.totalorder %s562_s15, %s562_s15 }
  0x95   :  { %v399_v60 = vadd.f32 %v398_v35, %v397_v2  ;;  %v222_v31 = vadd.f32 %v221_v33, %v220_v58  ;;  %v289_v39 = vmul.f32 %v89_v55, %v89_v55  ;;  %v410_v4 = vsel %vm93_vm0, %v287_v24, 0.0  ;;  %p612_p8 = scmp.ne.s32.totalorder %s562_s15, %s611_s1  ;;  %p617_p10 = scmp.lt.s32.totalorder %s611_s1, %s611_s1 }
  0x96   :  { %v290_v16 = vmul.f32 %v90_v32, %v90_v32  ;;  %v412_v28 = vsel %vm93_vm0, %v288_v1, 0.0 }
  0x97   :  { %v401_v43 = vadd.f32 %v400_v23, %v399_v60  ;;  %v223_v9 = vrot.slane %v222_v31, 2  ;;  %v414_v41 = vsel %vm93_vm0, %v289_v39, 0.0  ;;  %p618_p11 = por %p617_p10, %p616_p9 }
  0x98   :  { %v416_v42 = vsel %vm93_vm0, %v290_v16, 0.0 }
  0x99   :  { %v403_v61 = vadd.f32 %v402_v19, %v401_v43  ;;  %v224_v5 = vadd.f32 %v223_v9, %v222_v31  ;;  %p619_p12 = pnand %p618_p11, %p612_p8 }
  0x9b   :  { %v405_v52 = vadd.f32 %v404_v11, %v403_v61  ;;  %v225_v57 = vrot.slane %v224_v5, 1 }
  0x9d   :  { %v407_v26 = vadd.f32 %v406_v29, %v405_v52  ;;  %v226_v36 = vadd.f32 %v225_v57, %v224_v5 }
  0x9f   :  { %v409_v10 = vadd.f32 %v408_v21, %v407_v26  ;;  %v424_v7 = vmul.f32 0.001953125, %v226_v36 }
  0xa1   :  { %v411_v56 = vadd.f32 %v410_v4, %v409_v10  ;;  %v426_v0 = vmul.f32 %v424_v7, %v424_v7 }
  0xa3   :  { %v413_v18 = vadd.f32 %v412_v28, %v411_v56 }
  0xa5   :  { %v415_v13 = vadd.f32 %v414_v41, %v413_v18 }
  0xa7   :  { %v417_v51 = vadd.f32 %v416_v42, %v415_v13 }
  0xa9   :  { %v418_v46 = vrot.slane %v417_v51, 4 }
  0xab   :  { %v419_v38 = vadd.f32 %v418_v46, %v417_v51 }
  0xad   :  { %v420_v48 = vrot.slane %v419_v38, 2 }
  0xaf   :  { %v421_v17 = vadd.f32 %v420_v48, %v419_v38 }
  0xb1   :  { %v422_v55 = vrot.slane %v421_v17, 1 }
  0xb3   :  { %v423_v6 = vadd.f32 %v422_v55, %v421_v17 }
  0xb5   :  { %v425_v15 = vmul.f32 0.001953125, %v423_v6 }
  0xb7   :  { %v427_v20 = vsub.f32 %v425_v15, %v426_v0 }
  0xb9   :  { %v428_v14 = vadd.f32 1e-05, %v427_v20 }
  0xbb   :  { %587 = vrsqrt.f32 %v428_v14 }
  0xc5   :  { %v588_v27 = vpop.eup %587 }
  0xc6   :  { %v430_v50 = vmul.f32 %v588_v27, %v91_v45 }
  0xc8   :  { %v431_v44 = vmul.f32 %v430_v50, %v424_v7  ;;  %434 = vst.msk [vmem:[#allocation2] sm:$0x1] %vm433_vm1, %v430_v50 }
  0xca   :  { %v432_v47 = vsub.f32 %v92_v63, %v431_v44 }
  0xcc   :  { %435 = vst.msk [vmem:[#allocation2 + $0x1] sm:$0x1] %vm433_vm1, %v432_v47 }
  0xcd   :  { %622 = shalt.err (!%p619_p12)
}
  0xce   :  { %s623_s3 = scalar_lea.hbm %s1490_s6, 32 }
  0xcf   :  { %p624_p13 = scmp.ne.s32.totalorder %s1490_s6, %s623_s3  ;;  %p627_p0 = scmp.lt.u32.totalorder %s623_s3, %s1490_s6 }
  0xd1   :  { %p629_p1 = pnand %p627_p0, %p624_p13 }
  0xd3   :  { %632 = shalt.err (!%p629_p1)
}
  0xd4   :  { %564 = dma.vmem_to_hbm [thread:$0]  %s562_s15, 32, %s1490_s6, [#allocation3]  }
  0xd5   :  { %633 = dma.done.wait [#allocation3], 32  }
  0xd6   :  { %634 = vsyncadd [#allocation3], 4294967264 }
  0xd7   :  { %635 = dma.done.wait [#allocation5], 32  }
  0xd8   :  { %636 = vsyncadd [#allocation5], 4294967264 }
  0xd9   :  { %581 = vsyncpa [#allocation3], 1 }
  0xda   :  { %582 = vsyncpa [#allocation5], 1 }

</bundles_post_ra>
